<compile_context>
chip_gen: v7x
topology: tpu7x:2x2x1
jax: 0.10.0
libtpu: 0.0.40
codegen_flags: <defaults>
</compile_context>

<pallas_src>
import jax
import jax.numpy as jnp
from jax.experimental import pallas as pl
from jax.experimental.pallas import tpu as pltpu


# ----------------------------------------------------------------------------
# Kernel
# ----------------------------------------------------------------------------
def critic_kernel(bot_ref, crew_ref, ship_ref,
                  enc_w_ref,   # (3, 121, 64) bf16   stacked bot/crew/ship encoder weights
                  fc1_w_ref,   # (3,  64, 128) bf16  fc1 weight split into its 64-row chunks
                  fc2_w_ref,   # (128, 64)     bf16
                  bias_ref,    # (8, 128) f32: rows 0-2 enc biases[:64], 3 fc1 bias,
                               #               4 fc2 bias[:64], 5 output weight[:64],
                               #               6 [output bias, 0...], 7 padding
                  out_ref):    # (TB, 1) f32
    f32 = jnp.float32
    bf16 = jnp.bfloat16

    bot = bot_ref[...].astype(bf16)
    crew = crew_ref[...].astype(bf16)
    ship = ship_ref[...].astype(bf16)

    # Per-branch encoders: Linear(121 -> 64) + ReLU (elementwise in f32).
    def enc(x, k):
        e = jnp.dot(x, enc_w_ref[k], preferred_element_type=f32)
        e = e + bias_ref[k:k + 1, 0:64]
        return jnp.maximum(e, 0.0).astype(bf16)

    bot_r = enc(bot, 0)
    crew_r = enc(crew, 1)
    ship_r = enc(ship, 2)

    # relu(cat([bot,crew,ship])) @ fc1 computed as the sum of three K=64
    # partial matmuls over the stacked fc1 chunks -- mathematically identical
    # to concat-then-matmul, avoids an in-kernel lane concat.
    h1 = (jnp.dot(bot_r, fc1_w_ref[0], preferred_element_type=f32)
          + jnp.dot(crew_r, fc1_w_ref[1], preferred_element_type=f32)
          + jnp.dot(ship_r, fc1_w_ref[2], preferred_element_type=f32)
          + bias_ref[3:4, :])
    h1 = jnp.maximum(h1, 0.0).astype(bf16)                       # relu(fc1)

    h2 = jnp.dot(h1, fc2_w_ref[...], preferred_element_type=f32) + bias_ref[4:5, 0:64]
    h2 = jnp.maximum(h2, 0.0)                                    # relu(fc2), f32

    # output Linear(64 -> 1): VPU multiply + lane reduction (no N=1 MXU pass).
    wo = bias_ref[5:6, 0:64]                                     # (1, 64)
    bo = bias_ref[6:7, 0:1]                                      # (1, 1)
    out_ref[...] = jnp.sum(h2 * wo, axis=-1, keepdims=True) + bo


# ----------------------------------------------------------------------------
# Parameter construction / packing
# ----------------------------------------------------------------------------
def make_params(key):
    """Raw f32 params with (in_features, out_features) weights, 1-D biases."""
    ks = jax.random.split(key, 12)
    scale = 0.1

    def lin(kw, kb, fan_in, fan_out):
        w = scale * jax.random.normal(kw, (fan_in, fan_out), jnp.float32)
        b = scale * jax.random.normal(kb, (fan_out,), jnp.float32)
        return w, b

    wb, bb = lin(ks[0], ks[1], 121, 64)     # botEncoder
    wc, bc = lin(ks[2], ks[3], 121, 64)     # crewEncoder
    ws, bs = lin(ks[4], ks[5], 121, 64)     # shipEncoder
    w1, b1 = lin(ks[6], ks[7], 192, 128)    # fc1
    w2, b2 = lin(ks[8], ks[9], 128, 64)     # fc2
    wo, bo = lin(ks[10], ks[11], 64, 1)     # output

    return dict(wb=wb, bb=bb, wc=wc, bc=bc, ws=ws, bs=bs,
                w1=w1, b1=b1, w2=w2, b2=b2, wo=wo, bo=bo)


def pack_params(raw):
    """Pack raw params into the 4 arrays the kernel consumes."""
    bf16 = jnp.bfloat16
    enc_w = jnp.stack([raw["wb"], raw["wc"], raw["ws"]]).astype(bf16)          # (3,121,64)
    fc1_w = jnp.stack([raw["w1"][0:64],
                       raw["w1"][64:128],
                       raw["w1"][128:192]]).astype(bf16)                       # (3,64,128)
    fc2_w = raw["w2"].astype(bf16)                                             # (128,64)

    bias = jnp.zeros((8, 128), jnp.float32)
    bias = bias.at[0, 0:64].set(raw["bb"])
    bias = bias.at[1, 0:64].set(raw["bc"])
    bias = bias.at[2, 0:64].set(raw["bs"])
    bias = bias.at[3, :].set(raw["b1"])
    bias = bias.at[4, 0:64].set(raw["b2"])
    bias = bias.at[5, 0:64].set(raw["wo"].reshape(64))
    bias = bias.at[6, 0].set(raw["bo"][0])
    return enc_w, fc1_w, fc2_w, bias


# ----------------------------------------------------------------------------
# Wrapper
# ----------------------------------------------------------------------------
def critic_forward(bot, crew, ship, packed):
    enc_w, fc1_w, fc2_w, bias = packed
    B = bot.shape[0]

    # Batch tile: multiple of 8 sublanes, capped at 512 rows.  At TB=512 the
    # double-buffered activation footprint is ~2 MiB -- comfortably inside the
    # v7x 64 MiB / 32 MiB-scoped VMEM budget as well as v5e/v6e.
    TB = min(512, ((B + 7) // 8) * 8)
    B_pad = pl.cdiv(B, TB) * TB
    if B_pad != B:
        pad = lambda x: jnp.pad(x, ((0, B_pad - B), (0, 0)))
        bot, crew, ship = pad(bot), pad(crew), pad(ship)

    grid = (B_pad // TB,)

    act_spec = pl.BlockSpec((TB, 121), lambda i: (i, 0))
    out_spec = pl.BlockSpec((TB, 1), lambda i: (i, 0))
    # Full-array blocks with constant index_maps: weights stay VMEM-resident
    # across batch grid steps (no re-DMA).
    encw_spec = pl.BlockSpec(enc_w.shape, lambda i: (0, 0, 0))
    fc1w_spec = pl.BlockSpec(fc1_w.shape, lambda i: (0, 0, 0))
    fc2w_spec = pl.BlockSpec(fc2_w.shape, lambda i: (0, 0))
    bias_spec = pl.BlockSpec(bias.shape, lambda i: (0, 0))

    flops = 2 * B_pad * (3 * 121 * 64 + 192 * 128 + 128 * 64 + 64)
    bytes_accessed = (enc_w.size + fc1_w.size + fc2_w.size) * 2 \
        + bias.size * 4 + 3 * B_pad * 121 * 4 + B_pad * 4

    out = pl.pallas_call(
        critic_kernel,
        out_shape=jax.ShapeDtypeStruct((B_pad, 1), jnp.float32),
        grid=grid,
        in_specs=[act_spec, act_spec, act_spec,
                  encw_spec, fc1w_spec, fc2w_spec, bias_spec],
        out_specs=out_spec,
        compiler_params=pltpu.CompilerParams(
            dimension_semantics=("parallel",)),
        cost_estimate=pl.CostEstimate(flops=flops, transcendentals=0,
                                      bytes_accessed=bytes_accessed),
    )(bot, crew, ship, enc_w, fc1_w, fc2_w, bias)

    return out[:B] if B_pad != B else out


# ----------------------------------------------------------------------------
# References
# ----------------------------------------------------------------------------
def critic_reference_f32(bot, crew, ship, raw):
    """Pure-f32 reference mirroring the PyTorch forward exactly (with concat)."""
    be = bot @ raw["wb"] + raw["bb"]
    ce = crew @ raw["wc"] + raw["bc"]
    se = ship @ raw["ws"] + raw["bs"]
    x = jnp.maximum(jnp.concatenate([be, ce, se], axis=1), 0.0)
    x = jnp.maximum(x @ raw["w1"] + raw["b1"], 0.0)
    x = jnp.maximum(x @ raw["w2"] + raw["b2"], 0.0)
    return x @ raw["wo"] + raw["bo"]


def critic_reference_bf16(bot, crew, ship, raw):
    """Pure-JAX reference using the same bf16-operand / f32-accumulate math as the kernel."""
    bf16, f32 = jnp.bfloat16, jnp.float32

    def dot(a, w):
        return jnp.dot(a.astype(bf16), w.astype(bf16), preferred_element_type=f32)

    be = jnp.maximum(dot(bot, raw["wb"]) + raw["bb"], 0.0)
    ce = jnp.maximum(dot(crew, raw["wc"]) + raw["bc"], 0.0)
    se = jnp.maximum(dot(ship, raw["ws"]) + raw["bs"], 0.0)
    h1 = jnp.maximum(dot(be, raw["w1"][0:64]) + dot(ce, raw["w1"][64:128])
                     + dot(se, raw["w1"][128:192]) + raw["b1"], 0.0)
    h2 = jnp.maximum(dot(h1, raw["w2"]) + raw["b2"], 0.0)
    return jnp.sum(h2 * raw["wo"].reshape(1, 64), axis=-1, keepdims=True) + raw["bo"]


# ----------------------------------------------------------------------------
if __name__ == "__main__":
    key = jax.random.PRNGKey(0)
    kp, kb, kc, ks = jax.random.split(key, 4)
    raw = make_params(kp)
    packed = pack_params(raw)

    B = 8
    bot = jax.random.normal(kb, (B, 121), jnp.float32)
    crew = jax.random.normal(kc, (B, 121), jnp.float32)
    ship = jax.random.normal(ks, (B, 121), jnp.float32)

    out = critic_forward(bot, crew, ship, packed)
    out = jax.block_until_ready(out)
    assert out.shape == (B, 1)

    # Exact-math check against a reference that uses identical bf16 dot operands.
    ref_bf16 = critic_reference_bf16(bot, crew, ship, raw)
    assert jnp.allclose(out, ref_bf16, atol=2e-3, rtol=2e-3), \
        f"bf16-matched mismatch: {jnp.max(jnp.abs(out - ref_bf16))}"

    # Coarse semantic check against the pure-f32 PyTorch-equivalent forward.
    ref_f32 = critic_reference_f32(bot, crew, ship, raw)
    assert jnp.allclose(out, ref_f32, atol=1e-1, rtol=1e-1), \
        f"f32 semantic mismatch: {jnp.max(jnp.abs(out - ref_f32))}"

    print("KERNEL_OK")
</pallas_src>

<mosaic_0001>
module attributes {stable_mosaic.version = 11 : i64} {
  func.func @critic_kernel(%arg0: i32, %arg1: memref<8x121xf32, #tpu.memory_space<vmem>>, %arg2: memref<8x121xf32, #tpu.memory_space<vmem>>, %arg3: memref<8x121xf32, #tpu.memory_space<vmem>>, %arg4: memref<3x121x64xbf16, #tpu.memory_space<vmem>>, %arg5: memref<3x64x128xbf16, #tpu.memory_space<vmem>>, %arg6: memref<128x64xbf16, #tpu.memory_space<vmem>>, %arg7: memref<8x128xf32, #tpu.memory_space<vmem>>, %arg8: memref<8x1xf32, #tpu.memory_space<vmem>>) attributes {dimension_semantics = [#tpu.dimension_semantics<parallel>], iteration_bounds = array<i64: 1>, scalar_prefetch = 0 : i64, scratch_operands = 0 : i64, tpu.core_type = #tpu.core_type<tc>, window_params = [{transform_indices = @transform_0, window_bounds = array<i64: 8, 121>}, {transform_indices = @transform_1, window_bounds = array<i64: 8, 121>}, {transform_indices = @transform_2, window_bounds = array<i64: 8, 121>}, {pipeline_mode = #tpu.pipeline_mode<synchronous>, transform_indices = @transform_3, window_bounds = array<i64: 3, 121, 64>}, {pipeline_mode = #tpu.pipeline_mode<synchronous>, transform_indices = @transform_4, window_bounds = array<i64: 3, 64, 128>}, {pipeline_mode = #tpu.pipeline_mode<synchronous>, transform_indices = @transform_5, window_bounds = array<i64: 128, 64>}, {pipeline_mode = #tpu.pipeline_mode<synchronous>, transform_indices = @transform_6, window_bounds = array<i64: 8, 128>}, {transform_indices = @transform_7, window_bounds = array<i64: 8, 1>}]} {
    %c0 = arith.constant 0 : index
    %c0_0 = arith.constant 0 : index
    %0 = vector.load %arg1[%c0, %c0_0] : memref<8x121xf32, #tpu.memory_space<vmem>>, vector<8x121xf32>
    %1 = arith.truncf %0 : vector<8x121xf32> to vector<8x121xbf16>
    %c0_1 = arith.constant 0 : index
    %c0_2 = arith.constant 0 : index
    %2 = vector.load %arg2[%c0_1, %c0_2] : memref<8x121xf32, #tpu.memory_space<vmem>>, vector<8x121xf32>
    %3 = arith.truncf %2 : vector<8x121xf32> to vector<8x121xbf16>
    %c0_3 = arith.constant 0 : index
    %c0_4 = arith.constant 0 : index
    %4 = vector.load %arg3[%c0_3, %c0_4] : memref<8x121xf32, #tpu.memory_space<vmem>>, vector<8x121xf32>
    %5 = arith.truncf %4 : vector<8x121xf32> to vector<8x121xbf16>
    %c0_5 = arith.constant 0 : index
    %c0_6 = arith.constant 0 : index
    %c0_7 = arith.constant 0 : index
    %6 = vector.load %arg4[%c0_5, %c0_6, %c0_7] : memref<3x121x64xbf16, #tpu.memory_space<vmem>>, vector<1x121x64xbf16>
    %7 = vector.shape_cast %6 : vector<1x121x64xbf16> to vector<121x64xbf16>
    %cst = arith.constant dense<0.000000e+00> : vector<8x64xf32>
    %8 = tpu.matmul %1, %7, %cst {dimension_numbers = #tpu.dot_dimension_numbers<[1], [0], [0], [1], [0, 0, 1, 1], [], []>} : vector<8x121xbf16>, vector<121x64xbf16>, vector<8x64xf32> -> vector<8x64xf32>
    %c0_8 = arith.constant 0 : index
    %c0_9 = arith.constant 0 : index
    %9 = vector.load %arg7[%c0_8, %c0_9] : memref<8x128xf32, #tpu.memory_space<vmem>>, vector<1x64xf32>
    %10 = vector.broadcast %9 : vector<1x64xf32> to vector<8x64xf32>
    %11 = arith.addf %8, %10 : vector<8x64xf32>
    %cst_10 = arith.constant 0.000000e+00 : f32
    %12 = vector.broadcast %cst_10 : f32 to vector<8x64xf32>
    %13 = arith.maximumf %11, %12 : vector<8x64xf32>
    %14 = arith.truncf %13 : vector<8x64xf32> to vector<8x64xbf16>
    %c1 = arith.constant 1 : index
    %c0_11 = arith.constant 0 : index
    %c0_12 = arith.constant 0 : index
    %15 = vector.load %arg4[%c1, %c0_11, %c0_12] : memref<3x121x64xbf16, #tpu.memory_space<vmem>>, vector<1x121x64xbf16>
    %16 = vector.shape_cast %15 : vector<1x121x64xbf16> to vector<121x64xbf16>
    %cst_13 = arith.constant dense<0.000000e+00> : vector<8x64xf32>
    %17 = tpu.matmul %3, %16, %cst_13 {dimension_numbers = #tpu.dot_dimension_numbers<[1], [0], [0], [1], [0, 0, 1, 1], [], []>} : vector<8x121xbf16>, vector<121x64xbf16>, vector<8x64xf32> -> vector<8x64xf32>
    %c1_14 = arith.constant 1 : index
    %c0_15 = arith.constant 0 : index
    %18 = vector.load %arg7[%c1_14, %c0_15] : memref<8x128xf32, #tpu.memory_space<vmem>>, vector<1x64xf32>
    %19 = vector.broadcast %18 : vector<1x64xf32> to vector<8x64xf32>
    %20 = arith.addf %17, %19 : vector<8x64xf32>
    %cst_16 = arith.constant 0.000000e+00 : f32
    %21 = vector.broadcast %cst_16 : f32 to vector<8x64xf32>
    %22 = arith.maximumf %20, %21 : vector<8x64xf32>
    %23 = arith.truncf %22 : vector<8x64xf32> to vector<8x64xbf16>
    %c2 = arith.constant 2 : index
    %c0_17 = arith.constant 0 : index
    %c0_18 = arith.constant 0 : index
    %24 = vector.load %arg4[%c2, %c0_17, %c0_18] : memref<3x121x64xbf16, #tpu.memory_space<vmem>>, vector<1x121x64xbf16>
    %25 = vector.shape_cast %24 : vector<1x121x64xbf16> to vector<121x64xbf16>
    %cst_19 = arith.constant dense<0.000000e+00> : vector<8x64xf32>
    %26 = tpu.matmul %5, %25, %cst_19 {dimension_numbers = #tpu.dot_dimension_numbers<[1], [0], [0], [1], [0, 0, 1, 1], [], []>} : vector<8x121xbf16>, vector<121x64xbf16>, vector<8x64xf32> -> vector<8x64xf32>
    %c2_20 = arith.constant 2 : index
    %c0_21 = arith.constant 0 : index
    %27 = vector.load %arg7[%c2_20, %c0_21] : memref<8x128xf32, #tpu.memory_space<vmem>>, vector<1x64xf32>
    %28 = vector.broadcast %27 : vector<1x64xf32> to vector<8x64xf32>
    %29 = arith.addf %26, %28 : vector<8x64xf32>
    %cst_22 = arith.constant 0.000000e+00 : f32
    %30 = vector.broadcast %cst_22 : f32 to vector<8x64xf32>
    %31 = arith.maximumf %29, %30 : vector<8x64xf32>
    %32 = arith.truncf %31 : vector<8x64xf32> to vector<8x64xbf16>
    %c0_23 = arith.constant 0 : index
    %c0_24 = arith.constant 0 : index
    %c0_25 = arith.constant 0 : index
    %33 = vector.load %arg5[%c0_23, %c0_24, %c0_25] : memref<3x64x128xbf16, #tpu.memory_space<vmem>>, vector<1x64x128xbf16>
    %34 = vector.shape_cast %33 : vector<1x64x128xbf16> to vector<64x128xbf16>
    %cst_26 = arith.constant dense<0.000000e+00> : vector<8x128xf32>
    %35 = tpu.matmul %14, %34, %cst_26 {dimension_numbers = #tpu.dot_dimension_numbers<[1], [0], [0], [1], [0, 0, 1, 1], [], []>} : vector<8x64xbf16>, vector<64x128xbf16>, vector<8x128xf32> -> vector<8x128xf32>
    %c1_27 = arith.constant 1 : index
    %c0_28 = arith.constant 0 : index
    %c0_29 = arith.constant 0 : index
    %36 = vector.load %arg5[%c1_27, %c0_28, %c0_29] : memref<3x64x128xbf16, #tpu.memory_space<vmem>>, vector<1x64x128xbf16>
    %37 = vector.shape_cast %36 : vector<1x64x128xbf16> to vector<64x128xbf16>
    %cst_30 = arith.constant dense<0.000000e+00> : vector<8x128xf32>
    %38 = tpu.matmul %23, %37, %cst_30 {dimension_numbers = #tpu.dot_dimension_numbers<[1], [0], [0], [1], [0, 0, 1, 1], [], []>} : vector<8x64xbf16>, vector<64x128xbf16>, vector<8x128xf32> -> vector<8x128xf32>
    %39 = arith.addf %35, %38 : vector<8x128xf32>
    %c2_31 = arith.constant 2 : index
    %c0_32 = arith.constant 0 : index
    %c0_33 = arith.constant 0 : index
    %40 = vector.load %arg5[%c2_31, %c0_32, %c0_33] : memref<3x64x128xbf16, #tpu.memory_space<vmem>>, vector<1x64x128xbf16>
    %41 = vector.shape_cast %40 : vector<1x64x128xbf16> to vector<64x128xbf16>
    %cst_34 = arith.constant dense<0.000000e+00> : vector<8x128xf32>
    %42 = tpu.matmul %32, %41, %cst_34 {dimension_numbers = #tpu.dot_dimension_numbers<[1], [0], [0], [1], [0, 0, 1, 1], [], []>} : vector<8x64xbf16>, vector<64x128xbf16>, vector<8x128xf32> -> vector<8x128xf32>
    %43 = arith.addf %39, %42 : vector<8x128xf32>
    %c3 = arith.constant 3 : index
    %c0_35 = arith.constant 0 : index
    %44 = vector.load %arg7[%c3, %c0_35] : memref<8x128xf32, #tpu.memory_space<vmem>>, vector<1x128xf32>
    %45 = vector.broadcast %44 : vector<1x128xf32> to vector<8x128xf32>
    %46 = arith.addf %43, %45 : vector<8x128xf32>
    %cst_36 = arith.constant 0.000000e+00 : f32
    %47 = vector.broadcast %cst_36 : f32 to vector<8x128xf32>
    %48 = arith.maximumf %46, %47 : vector<8x128xf32>
    %49 = arith.truncf %48 : vector<8x128xf32> to vector<8x128xbf16>
    %c0_37 = arith.constant 0 : index
    %c0_38 = arith.constant 0 : index
    %50 = vector.load %arg6[%c0_37, %c0_38] : memref<128x64xbf16, #tpu.memory_space<vmem>>, vector<128x64xbf16>
    %cst_39 = arith.constant dense<0.000000e+00> : vector<8x64xf32>
    %51 = tpu.matmul %49, %50, %cst_39 {dimension_numbers = #tpu.dot_dimension_numbers<[1], [0], [0], [1], [0, 0, 1, 1], [], []>} : vector<8x128xbf16>, vector<128x64xbf16>, vector<8x64xf32> -> vector<8x64xf32>
    %c4 = arith.constant 4 : index
    %c0_40 = arith.constant 0 : index
    %52 = vector.load %arg7[%c4, %c0_40] : memref<8x128xf32, #tpu.memory_space<vmem>>, vector<1x64xf32>
    %53 = vector.broadcast %52 : vector<1x64xf32> to vector<8x64xf32>
    %54 = arith.addf %51, %53 : vector<8x64xf32>
    %cst_41 = arith.constant 0.000000e+00 : f32
    %55 = vector.broadcast %cst_41 : f32 to vector<8x64xf32>
    %56 = arith.maximumf %54, %55 : vector<8x64xf32>
    %c5 = arith.constant 5 : index
    %c0_42 = arith.constant 0 : index
    %57 = vector.load %arg7[%c5, %c0_42] : memref<8x128xf32, #tpu.memory_space<vmem>>, vector<1x64xf32>
    %c6 = arith.constant 6 : index
    %c0_43 = arith.constant 0 : index
    %58 = vector.load %arg7[%c6, %c0_43] : memref<8x128xf32, #tpu.memory_space<vmem>>, vector<1x1xf32>
    %59 = vector.broadcast %57 : vector<1x64xf32> to vector<8x64xf32>
    %60 = arith.mulf %56, %59 : vector<8x64xf32>
    %cst_44 = arith.constant dense<0.000000e+00> : vector<8xf32>
    %61 = vector.multi_reduction <add>, %60, %cst_44 [1] : vector<8x64xf32> to vector<8xf32>
    %62 = vector.shape_cast %61 : vector<8xf32> to vector<8x1xf32>
    %63 = vector.broadcast %58 : vector<1x1xf32> to vector<8x1xf32>
    %64 = arith.addf %62, %63 : vector<8x1xf32>
    %c0_45 = arith.constant 0 : index
    %c0_46 = arith.constant 0 : index
    %65 = vector.load %arg8[%c0_45, %c0_46] : memref<8x1xf32, #tpu.memory_space<vmem>>, vector<8x1xf32>
    tpu.vector_store %arg8[%c0_45, %c0_46], %64 {strides = array<i32>} : memref<8x1xf32, #tpu.memory_space<vmem>>, vector<8x1xf32>,
    return
  }
  func.func @transform_0(%arg0: i32) -> (i32, i32) {
    %c0_i32 = arith.constant 0 : i32
    %c0_i32_0 = arith.constant 0 : i32
    return %arg0, %c0_i32 : i32, i32
  }
  func.func @transform_1(%arg0: i32) -> (i32, i32) {
    %c0_i32 = arith.constant 0 : i32
    %c0_i32_0 = arith.constant 0 : i32
    return %arg0, %c0_i32 : i32, i32
  }
  func.func @transform_2(%arg0: i32) -> (i32, i32) {
    %c0_i32 = arith.constant 0 : i32
    %c0_i32_0 = arith.constant 0 : i32
    return %arg0, %c0_i32 : i32, i32
  }
  func.func @transform_3(%arg0: i32) -> (i32, i32, i32) {
    %c0_i32 = arith.constant 0 : i32
    %c0_i32_0 = arith.constant 0 : i32
    %c0_i32_1 = arith.constant 0 : i32
    %c0_i32_2 = arith.constant 0 : i32
    return %c0_i32, %c0_i32_0, %c0_i32_1 : i32, i32, i32
  }
  func.func @transform_4(%arg0: i32) -> (i32, i32, i32) {
    %c0_i32 = arith.constant 0 : i32
    %c0_i32_0 = arith.constant 0 : i32
    %c0_i32_1 = arith.constant 0 : i32
    %c0_i32_2 = arith.constant 0 : i32
    return %c0_i32, %c0_i32_0, %c0_i32_1 : i32, i32, i32
  }
  func.func @transform_5(%arg0: i32) -> (i32, i32) {
    %c0_i32 = arith.constant 0 : i32
    %c0_i32_0 = arith.constant 0 : i32
    %c0_i32_1 = arith.constant 0 : i32
    return %c0_i32, %c0_i32_0 : i32, i32
  }
  func.func @transform_6(%arg0: i32) -> (i32, i32) {
    %c0_i32 = arith.constant 0 : i32
    %c0_i32_0 = arith.constant 0 : i32
    %c0_i32_1 = arith.constant 0 : i32
    return %c0_i32, %c0_i32_0 : i32, i32
  }
  func.func @transform_7(%arg0: i32) -> (i32, i32) {
    %c0_i32 = arith.constant 0 : i32
    %c0_i32_0 = arith.constant 0 : i32
    return %arg0, %c0_i32 : i32, i32
  }
}

</mosaic_0001>

<bundles_post_ra>
// kernel: tpu_custom_call.1
= control target key start
LH: loop header
LB: loop body
LE: loop exit
PB: predicated region body
PF: predicated region fallthrough
CT: control target
= control target key end

     0   :  { %v1075_v0 = vmov 0.0   ;;  %vm1076_vm0 = vmmov 0   ;;  %vm105_vm1 = vcmask 1043456   ;;  %vm106_vm2 = vcmask 1044480   ;;  %s1353_s3 = inlined_call_operand.vmem [shape: bf16[3,121,64], index: 3, kind: input, shape index: {}]   ;;  %s1354_s0 = inlined_call_operand.vmem [shape: f32[8,121], index: 0, kind: input, shape index: {}]   ;;  %s1355_s1 = inlined_call_operand.vmem [shape: f32[8,121], index: 1, kind: input, shape index: {}]   ;;  %s1356_s4 = inlined_call_operand.vmem [shape: bf16[3,64,128], index: 4, kind: input, shape index: {}]   ;;  %s1357_s2 = inlined_call_operand.vmem [shape: f32[8,121], index: 2, kind: input, shape index: {}]   ;;  %s1358_s5 = inlined_call_operand.vmem [shape: bf16[128,64], index: 5, kind: input, shape index: {}]   ;;  %s1359_s6 = inlined_call_operand.vmem [shape: f32[8,128], index: 6, kind: input, shape index: {}]   ;;  %s1360_s7 = inlined_call_operand.vmem [shape: f32[8,1], index: 7, kind: output, shape index: {}]  }
   0x1   :  { %912 = vmatprep.subr.bf16.mxu0 %v1075_v0  ;;  %932 = vmatprep.subr.bf16.mxu1 %v1075_v0  ;;  %v1031_v1 = vld [vmem:[%s1353_s3] sm:$0xff]   ;;  %v1033_v3 = vld [vmem:[%s1353_s3 + $0x8] sm:$0xff]   ;;  %v1035_v5 = vld [vmem:[%s1353_s3 + $0x10] sm:$0xff]   ;;  %v1077_v12 = vmov 65535   ;;  %vm101_vm3 = vcmask 990208   ;;  %vm429_vm4 = vcmask 523264  }
   0x2   :  { %v1032_v2 = vld [vmem:[%s1353_s3 + $0x40] sm:$0xff]   ;;  %913 = vmatpush3.bf16.msra.mxu0 %v1031_v1  ;;  %v1034_v4 = vld [vmem:[%s1353_s3 + $0x48] sm:$0xff]   ;;  %928 = vmatprep.mubr.msk.bf16.mxu0 %vm1076_vm0, %v1075_v0  ;;  %v1036_v6 = vld [vmem:[%s1353_s3 + $0x50] sm:$0xff]   ;;  %v107_v13 = vsel %vm105_vm1, 4294967295, %v1077_v12  ;;  %vm750_vm5 = vcmask 7168  }
   0x3   :  { %933 = vmatpush3.bf16.msra.mxu1 %v1032_v2  ;;  %914 = vmatprep.subr.bf16.mxu0 %v1075_v0  ;;  %v1037_v7 = vld [vmem:[%s1353_s3 + $0x18] sm:$0xff]   ;;  %v1039_v9 = vld [vmem:[%s1353_s3 + $0x20] sm:$0xff]   ;;  %v1041_v11 = vld [vmem:[%s1353_s3 + $0x28] sm:$0xff]   ;;  %v1176_v17 = vsel %vm106_vm2, %v107_v13, 0 }
   0x4   :  { %934 = vmatprep.subr.bf16.mxu1 %v1075_v0  ;;  %948 = vmatprep.mubr.msk.bf16.mxu1 %vm1076_vm0, %v1075_v0  ;;  %v1038_v8 = vld [vmem:[%s1353_s3 + $0x58] sm:$0xff]   ;;  %v1040_v10 = vld [vmem:[%s1353_s3 + $0x60] sm:$0xff]   ;;  %v1042_v14 = vld [vmem:[%s1353_s3 + $0x68] sm:$0xff]  }
   0x5   :  { %v1043_v15 = vld [vmem:[%s1353_s3 + $0x30] sm:$0xff]   ;;  %v1045_v18 = vld [vmem:[%s1353_s3 + $0x38] sm:$0x1f]   ;;  %v27_v21 = vld [vmem:[%s1354_s0] sm:$0xff] }
   0x6   :  { %915 = vmatpush3.bf16.msra.mxu0 %v1033_v3  ;;  %v1044_v16 = vld [vmem:[%s1353_s3 + $0x70] sm:$0xff]   ;;  %v1046_v19 = vld [vmem:[%s1353_s3 + $0x78] sm:$0x1f]   ;;  %v110_v20 = vand.u32 %v1045_v18, %v1176_v17  ;;  %v29_v23 = vld [vmem:[%s1355_s1] sm:$0xff]  ;;  %v28_v25 = vpack.c.bf16 %v27_v21, %v27_v21 }
   0x7   :  { %935 = vmatpush3.bf16.msra.mxu1 %v1034_v4  ;;  %916 = vmatprep.subr.bf16.mxu0 %v1075_v0  ;;  %v227_v22 = vand.u32 %v1046_v19, %v1176_v17  ;;  %v1047_v24 = vld [vmem:[%s1353_s3 + $0x80] sm:$0xff]   ;;  %v30_v26 = vpack.c.bf16 %v29_v23, %v29_v23  ;;  %v1048_v28 = vld [vmem:[%s1353_s3 + $0x88] sm:$0xff]   ;;  %v1049_v30 = vld [vmem:[%s1353_s3 + $0x90] sm:$0xff]  }
   0x8   :  { %936 = vmatprep.subr.bf16.mxu1 %v1075_v0  ;;  %v1055_v27 = vld [vmem:[%s1356_s4 + $0x20] sm:$0xff]   ;;  %v1056_v29 = vld [vmem:[%s1356_s4 + $0x28] sm:$0xff]   ;;  %v1057_v31 = vld [vmem:[%s1356_s4 + $0x30] sm:$0xff]  }
   0x9   :  { %v1050_v32 = vld [vmem:[%s1353_s3 + $0x98] sm:$0xff]   ;;  %v1051_v33 = vld [vmem:[%s1353_s3 + $0xa0] sm:$0xff]   ;;  %v1052_v34 = vld [vmem:[%s1353_s3 + $0xa8] sm:$0xff]  }
   0xa   :  { %917 = vmatpush3.bf16.msra.mxu0 %v1035_v5  ;;  %v1053_v35 = vld [vmem:[%s1353_s3 + $0xb0] sm:$0xff]   ;;  %v1054_v36 = vld [vmem:[%s1353_s3 + $0xb8] sm:$0x1f]   ;;  %v31_v38 = vld [vmem:[%s1357_s2] sm:$0xff] }
   0xb   :  { %937 = vmatpush3.bf16.msra.mxu1 %v1036_v6  ;;  %918 = vmatprep.subr.bf16.mxu0 %v1075_v0  ;;  %v344_v37 = vand.u32 %v1054_v36, %v1176_v17  ;;  %v32_v39 = vpack.c.bf16 %v31_v38, %v31_v38  ;;  %v1058_v40 = vld [vmem:[%s1356_s4 + $0x38] sm:$0xff]   ;;  %v1063_v41 = vld [vmem:[%s1356_s4 + $0x40] sm:$0xff]   ;;  %v1064_v42 = vld [vmem:[%s1356_s4 + $0x48] sm:$0xff]  }
   0xc   :  { %938 = vmatprep.subr.bf16.mxu1 %v1075_v0  ;;  %v1065_v43 = vld [vmem:[%s1356_s4 + $0x50] sm:$0xff]   ;;  %v1066_v44 = vld [vmem:[%s1356_s4 + $0x58] sm:$0xff]   ;;  %v782_v45 = vld [vmem:[%s1359_s6 + $0x1] ss:$0 sm:$0xff] }
   0xd   :  { %v1059_v56 = vld [vmem:[%s1356_s4] sm:$0xff]   ;;  %v1060_v58 = vld [vmem:[%s1356_s4 + $0x8] sm:$0xff]   ;;  %v1061_v60 = vld [vmem:[%s1356_s4 + $0x10] sm:$0xff]  }
   0xe   :  { %919 = vmatpush3.bf16.msra.mxu0 %v1037_v7  ;;  %v756_v59 = vld [vmem:[%s1359_s6] ss:$0 sm:$0xff]  ;;  %v1062_v62 = vld [vmem:[%s1356_s4 + $0x18] sm:$0xff]   ;;  %v808_v3 = vld [vmem:[%s1359_s6 + $0x2] ss:$0 sm:$0xff] }
   0xf   :  { %939 = vmatpush3.bf16.msra.mxu1 %v1038_v8  ;;  %920 = vmatprep.subr.bf16.mxu0 %v1075_v0  ;;  %v1067_v1 = vld [vmem:[%s1358_s5] sm:$0xff]   ;;  %v1069_v12 = vld [vmem:[%s1358_s5 + $0x10] sm:$0xff]   ;;  %v1070_v13 = vld [vmem:[%s1358_s5 + $0x18] sm:$0xff]  }
  0x10   :  { %940 = vmatprep.subr.bf16.mxu1 %v1075_v0  ;;  %v1074_v17 = vld [vmem:[%s1358_s5 + $0x38] sm:$0xff]  }
  0x12   :  { %921 = vmatpush3.bf16.msra.mxu0 %v1039_v9 }
  0x13   :  { %941 = vmatpush3.bf16.msra.mxu1 %v1040_v10  ;;  %922 = vmatprep.subr.bf16.mxu0 %v1075_v0 }
  0x14   :  { %942 = vmatprep.subr.bf16.mxu1 %v1075_v0 }
  0x16   :  { %923 = vmatpush3.bf16.msra.mxu0 %v1041_v11  ;;  %v1068_v11 = vld [vmem:[%s1358_s5 + $0x8] sm:$0xff]  }
  0x17   :  { %943 = vmatpush3.bf16.msra.mxu1 %v1042_v14  ;;  %924 = vmatprep.subr.bf16.mxu0 %v1075_v0  ;;  %v1071_v14 = vld [vmem:[%s1358_s5 + $0x20] sm:$0xff]  }
  0x18   :  { %944 = vmatprep.subr.bf16.mxu1 %v1075_v0 }
  0x1a   :  { %925 = vmatpush3.bf16.msra.mxu0 %v1043_v15  ;;  %v1072_v15 = vld [vmem:[%s1358_s5 + $0x28] sm:$0xff]  }
  0x1b   :  { %945 = vmatpush3.bf16.msra.mxu1 %v1044_v16  ;;  %926 = vmatprep.subr.bf16.mxu0 %v1075_v0  ;;  %v1073_v16 = vld [vmem:[%s1358_s5 + $0x30] sm:$0xff]  }
  0x1c   :  { %946 = vmatprep.subr.bf16.mxu1 %v1075_v0 }
  0x1e   :  { %927 = vmatpush3.bf16.msra.mxu0 %v110_v20 }
  0x1f   :  { %947 = vmatpush3.bf16.msra.mxu1 %v227_v22  ;;  %952 = vmatprep.subr.bf16.mxu0 %v1075_v0 }
  0x20   :  { %972 = vmatprep.subr.bf16.mxu1 %v1075_v0 }
  0x21   :  { %929 = vmatmul.mubr.msk.bf16.vlgmr.msra.gmra.mrb[0].mxu0 %vm101_vm3, %v28_v25 }
  0x22   :  { %949 = vmatmul.mubr.msk.bf16.vlgmr.msra.gmra.mrb[0].mxu1 %vm101_vm3, %v30_v26  ;;  %953 = vmatpush3.bf16.msra.mxu0 %v1047_v24 }
  0x23   :  { %954 = vmatprep.subr.bf16.mxu0 %v1075_v0  ;;  %968 = vmatprep.mubr.msk.bf16.mxu0 %vm1076_vm0, %v1075_v0 }
  0x24   :  { %973 = vmatpush3.bf16.msra.mxu1 %v1055_v27  ;;  %980 = vmatprep.mubr.msk.bf16.mxu1 %vm1076_vm0, %v1075_v0 }
  0x25   :  { %974 = vmatprep.subr.bf16.mxu1 %v1075_v0 }
  0x26   :  { %955 = vmatpush3.bf16.msra.mxu0 %v1048_v28  ;;  %v849_v28 = vld [vmem:[%s1359_s6 + $0x3] ss:$0 sm:$0xff] }
  0x27   :  { %956 = vmatprep.subr.bf16.mxu0 %v1075_v0 }
  0x28   :  { %975 = vmatpush3.bf16.msra.mxu1 %v1056_v29 }
  0x29   :  { %976 = vmatprep.subr.bf16.mxu1 %v1075_v0 }
  0x2a   :  { %957 = vmatpush3.bf16.msra.mxu0 %v1049_v30 }
  0x2b   :  { %958 = vmatprep.subr.bf16.mxu0 %v1075_v0 }
  0x2c   :  { %977 = vmatpush3.bf16.msra.mxu1 %v1057_v31 }
  0x2d   :  { %978 = vmatprep.subr.bf16.mxu1 %v1075_v0 }
  0x2e   :  { %959 = vmatpush3.bf16.msra.mxu0 %v1050_v32 }
  0x2f   :  { %960 = vmatprep.subr.bf16.mxu0 %v1075_v0 }
  0x30   :  { %979 = vmatpush3.bf16.msra.mxu1 %v1058_v40  ;;  %v859_v40 = vld [vmem:[%s1359_s6 + $0x5] ss:$0 sm:$0xff] }
  0x31   :  { %984 = vmatprep.subr.bf16.mxu1 %v1075_v0 }
  0x32   :  { %961 = vmatpush3.bf16.msra.mxu0 %v1051_v33 }
  0x33   :  { %962 = vmatprep.subr.bf16.mxu0 %v1075_v0 }
  0x36   :  { %963 = vmatpush3.bf16.msra.mxu0 %v1052_v34 }
  0x37   :  { %964 = vmatprep.subr.bf16.mxu0 %v1075_v0 }
  0x3a   :  { %965 = vmatpush3.bf16.msra.mxu0 %v1053_v35  ;;  %v850_v35 = vld [vmem:[%s1359_s6 + $0x4] ss:$0 sm:$0xff] }
  0x3b   :  { %966 = vmatprep.subr.bf16.mxu0 %v1075_v0 }
  0x3e   :  { %967 = vmatpush3.bf16.msra.mxu0 %v344_v37 }
  0x3f   :  { %996 = vmatprep.subr.bf16.mxu0 %v1075_v0 }
  0x41   :  { %969 = vmatmul.mubr.msk.bf16.vlgmr.msra.gmra.mrb[4].mxu0 %vm101_vm3, %v32_v39 }
  0x42   :  { %1004 = vmatprep.mubr.msk.bf16.mxu0 %vm1076_vm0, %v1075_v0  ;;  %997 = vmatpush3.bf16.msra.mxu0 %v1063_v41 }
  0x43   :  { %998 = vmatprep.subr.bf16.mxu0 %v1075_v0 }
  0x46   :  { %999 = vmatpush3.bf16.msra.mxu0 %v1064_v42 }
  0x47   :  { %1000 = vmatprep.subr.bf16.mxu0 %v1075_v0 }
  0x4a   :  { %1001 = vmatpush3.bf16.msra.mxu0 %v1065_v43 }
  0x4b   :  { %1002 = vmatprep.subr.bf16.mxu0 %v1075_v0 }
  0x4e   :  { %1003 = vmatpush3.bf16.msra.mxu0 %v1066_v44 }
  0xf4   :  { %v146_v46 = vpop.f32.mrb[0].mxu0 }
  0xf5   :  { %v263_v47 = vpop.f32.mrb[0].mxu1  ;;  %v930_v48 = vpop.f32.mrb[1].mxu0  ;;  %v147_v61 = vadd.f32 %v756_v59, %v146_v46 }
  0xf6   :  { %v264_v49 = vadd.f32 %v782_v45, %v263_v47  ;;  %v149_v50 = vpop.f32.mrb[2].mxu0  ;;  %v950_v51 = vpop.f32.mrb[1].mxu1  ;;  %v860_v45 = vld [vmem:[%s1359_s6 + $0x6] ss:$0 sm:$0xff] }
  0xf7   :  { %v931_v52 = vpop.f32.mrb[3].mxu0  ;;  %v266_v53 = vpop.f32.mrb[2].mxu1  ;;  %v152_v63 = vmax.f32 %v147_v61, 0.0 }
  0xf8   :  { %v269_v54 = vmax.f32 %v264_v49, 0.0  ;;  %v951_v55 = vpop.f32.mrb[3].mxu1 }
  0xf9   :  { %v153_v2 = vpack.c.bf16 %v152_v63, %v152_v63 }
  0xfa   :  { %v270_v57 = vpack.c.bf16 %v269_v54, %v269_v54 }
  0xfc   :  { %981 = vmatmul.mubr.msk.bf16.vlgmr.msra.gmra.mrb[4].mxu1 %vm429_vm4, %v270_v57 }
  0xfd   :  { %985 = vmatpush3.bf16.msra.mxu1 %v1059_v56  ;;  %992 = vmatprep.mubr.msk.bf16.mxu1 %vm1076_vm0, %v1075_v0 }
  0xfe   :  { %986 = vmatprep.subr.bf16.mxu1 %v1075_v0 }
 0x101   :  { %987 = vmatpush3.bf16.msra.mxu1 %v1060_v58 }
 0x102   :  { %988 = vmatprep.subr.bf16.mxu1 %v1075_v0 }
 0x105   :  { %989 = vmatpush3.bf16.msra.mxu1 %v1061_v60 }
 0x106   :  { %990 = vmatprep.subr.bf16.mxu1 %v1075_v0 }
 0x109   :  { %991 = vmatpush3.bf16.msra.mxu1 %v1062_v62 }
 0x10a   :  { %1008 = vmatprep.subr.bf16.mxu1 %v1075_v0 }
 0x10c   :  { %993 = vmatmul.mubr.msk.bf16.vlgmr.msra.gmra.mrb[8].mxu1 %vm429_vm4, %v153_v2 }
 0x10d   :  { %1009 = vmatpush3.bf16.msra.mxu1 %v1067_v1  ;;  %1024 = vmatprep.mubr.msk.bf16.mxu1 %vm1076_vm0, %v1075_v0 }
 0x10e   :  { %1010 = vmatprep.subr.bf16.mxu1 %v1075_v0 }
 0x111   :  { %1011 = vmatpush3.bf16.msra.mxu1 %v1068_v11 }
 0x112   :  { %1012 = vmatprep.subr.bf16.mxu1 %v1075_v0 }
 0x114   :  { %v380_v4 = vpop.f32.mrb[4].mxu0 }
 0x115   :  { %v381_v5 = vadd.f32 %v808_v3, %v380_v4  ;;  %v970_v6 = vpop.f32.mrb[5].mxu0  ;;  %1013 = vmatpush3.bf16.msra.mxu1 %v1069_v12 }
 0x116   :  { %v383_v7 = vpop.f32.mrb[6].mxu0  ;;  %1014 = vmatprep.subr.bf16.mxu1 %v1075_v0 }
 0x117   :  { %v386_v8 = vmax.f32 %v381_v5, 0.0  ;;  %v971_v9 = vpop.f32.mrb[7].mxu0 }
 0x119   :  { %v387_v10 = vpack.c.bf16 %v386_v8, %v386_v8  ;;  %1015 = vmatpush3.bf16.msra.mxu1 %v1070_v13 }
 0x11a   :  { %1016 = vmatprep.subr.bf16.mxu1 %v1075_v0 }
 0x11b   :  { %1005 = vmatmul.mubr.msk.bf16.vlgmr.msra.gmra.mrb[8].mxu0 %vm429_vm4, %v387_v10 }
 0x11d   :  { %1017 = vmatpush3.bf16.msra.mxu1 %v1071_v14 }
 0x11e   :  { %1018 = vmatprep.subr.bf16.mxu1 %v1075_v0 }
 0x121   :  { %1019 = vmatpush3.bf16.msra.mxu1 %v1072_v15 }
 0x122   :  { %1020 = vmatprep.subr.bf16.mxu1 %v1075_v0 }
 0x125   :  { %1021 = vmatpush3.bf16.msra.mxu1 %v1073_v16 }
 0x126   :  { %1022 = vmatprep.subr.bf16.mxu1 %v1075_v0 }
 0x129   :  { %1023 = vmatpush3.bf16.msra.mxu1 %v1074_v17 }
 0x1cf   :  { %v467_v18 = vpop.f32.mrb[4].mxu1 }
 0x1d0   :  { %v982_v19 = vpop.f32.mrb[5].mxu1 }
 0x1d1   :  { %v470_v20 = vpop.f32.mrb[6].mxu1 }
 0x1d2   :  { %v983_v21 = vpop.f32.mrb[7].mxu1 }
 0x1df   :  { %v534_v22 = vpop.f32.mrb[8].mxu1 }
 0x1e0   :  { %v535_v23 = vadd.f32 %v534_v22, %v467_v18  ;;  %v994_v24 = vpop.f32.mrb[9].mxu1 }
 0x1e1   :  { %v537_v25 = vpop.f32.mrb[10].mxu1 }
 0x1e2   :  { %v995_v26 = vpop.f32.mrb[11].mxu1 }
 0x1ee   :  { %v610_v27 = vpop.f32.mrb[8].mxu0 }
 0x1ef   :  { %v616_v0 = vadd.f32 %v610_v27, %v535_v23  ;;  %v1006_v29 = vpop.f32.mrb[9].mxu0 }
 0x1f0   :  { %v613_v30 = vpop.f32.mrb[10].mxu0 }
 0x1f1   :  { %v622_v31 = vadd.f32 %v849_v28, %v616_v0  ;;  %v1007_v32 = vpop.f32.mrb[11].mxu0 }
 0x1f3   :  { %v623_v33 = vmax.f32 %v622_v31, 0.0 }
 0x1f5   :  { %v624_v34 = vpack.c.bf16 %v623_v33, %v623_v33 }
 0x1f7   :  { %1025 = vmatmul.mubr.bf16.vlgmr.msra.gmra.mrb[12].mxu1 %v624_v34 }
 0x2ca   :  { %v728_v36 = vpop.f32.mrb[12].mxu1 }
 0x2cb   :  { %v729_v37 = vadd.f32 %v850_v35, %v728_v36  ;;  %v1026_v38 = vpop.f32.mrb[13].mxu1 }
 0x2cc   :  { %v731_v39 = vpop.f32.mrb[14].mxu1 }
 0x2cd   :  { %v734_v41 = vmax.f32 %v729_v37, 0.0  ;;  %v1027_v42 = vpop.f32.mrb[15].mxu1 }
 0x2cf   :  { %v741_v43 = vmul.f32 %v859_v40, %v734_v41 }
 0x2d1   :  { %v742_v44 = vsel %vm429_vm4, %v741_v43, 0.0 }
 0x2d2   :  { %743 = vadd.xlane.f32.xlu0 %v742_v44 }
 0x35f   :  { %v744_v46 = vpop.xlane.xlu0 %743 }
 0x360   :  { %v749_v47 = vadd.f32 %v860_v45, %v744_v46 }
 0x362   :  { %751 = vst.msk [vmem:[%s1360_s7] sm:$0xff] %vm750_vm5, %v749_v47 }

</bundles_post_ra>
